<compile_context>
chip_gen: v7x
topology: tpu7x:2x2x1
jax: 0.10.0
libtpu: 0.0.40
codegen_flags: <defaults>
</compile_context>

<pallas_src>
import jax
import jax.numpy as jnp
from jax.experimental import pallas as pl
from jax.experimental.pallas import tpu as pltpu

# ----------------------------- model config ---------------------------------
EMBEDDING_DIM = 32
GENERATOR_DIM = (32, 32)     # two Residual blocks
DATA_DIM = 16
BATCH = 8
BN_EPS = 1e-5
PAD = 128                    # lane-dense padded feature width


# ------------------------------ Pallas kernel -------------------------------
def generator_kernel(x_ref, w_ref, p_ref, out_ref):
    """Fused Residual -> Residual -> Linear for one BN batch (grid step)."""
    x = x_ref[0]                                   # (B, PAD) f32; lanes >= 32 are zero

    w1, w2a, w2b = w_ref[0], w_ref[1], w_ref[2]     # (PAD, PAD) each, zero-padded
    w3a, w3b, w3c = w_ref[3], w_ref[4], w_ref[5]

    b1, g1, be1 = p_ref[0:1, :], p_ref[1:2, :], p_ref[2:3, :]
    b2, g2, be2 = p_ref[3:4, :], p_ref[4:5, :], p_ref[5:6, :]
    b3 = p_ref[6:7, :]

    def bn_relu(y, gamma, beta):
        # Training-mode BatchNorm1d folded into a single scale/shift pair.
        mean = jnp.mean(y, axis=0, keepdims=True)
        d = y - mean
        var = jnp.mean(d * d, axis=0, keepdims=True)           # biased batch variance
        scale = gamma * jax.lax.rsqrt(var + BN_EPS)             # padded lanes: gamma=0
        shift = beta - mean * scale
        return jnp.maximum(y * scale + shift, 0.0)

    # Residual 1: y1 = ReLU(BN(x @ W1 + b1))
    y1 = bn_relu(jnp.dot(x, w1, preferred_element_type=jnp.float32) + b1, g1, be1)

    # Residual 2: cat([y1, x]) @ W2 decomposed into two lane-aligned matmuls.
    z2 = (jnp.dot(y1, w2a, preferred_element_type=jnp.float32)
          + jnp.dot(x, w2b, preferred_element_type=jnp.float32) + b2)
    y2 = bn_relu(z2, g2, be2)

    # Final Linear: cat([y2, y1, x]) @ W3 decomposed into three matmuls.
    out = (jnp.dot(y2, w3a, preferred_element_type=jnp.float32)
           + jnp.dot(y1, w3b, preferred_element_type=jnp.float32)
           + jnp.dot(x, w3c, preferred_element_type=jnp.float32) + b3)

    out_ref[0] = out.astype(out_ref.dtype)


# ------------------------------- wrappers ------------------------------------
def generator_forward_batched(xb, w_slab, p_slab):
    """xb: (num_batches, B, EMBEDDING_DIM). Each leading entry is one independent
    PyTorch batch; BatchNorm statistics are computed within each grid step."""
    nb, b, e = xb.shape
    x_pad = jnp.zeros((nb, b, PAD), jnp.float32).at[..., :e].set(xb)

    out_pad = pl.pallas_call(
        generator_kernel,
        out_shape=jax.ShapeDtypeStruct((nb, b, PAD), jnp.float32),
        grid_spec=pltpu.PrefetchScalarGridSpec(
            num_scalar_prefetch=0,
            grid=(nb,),
            in_specs=[
                pl.BlockSpec((1, b, PAD), lambda i: (i, 0, 0)),     # activations
                pl.BlockSpec((6, PAD, PAD), lambda i: (0, 0, 0)),   # weight slab (resident)
                pl.BlockSpec((8, PAD), lambda i: (0, 0)),           # bias/gamma/beta slab
            ],
            out_specs=pl.BlockSpec((1, b, PAD), lambda i: (i, 0, 0)),
        ),
        compiler_params=pltpu.CompilerParams(dimension_semantics=("parallel",)),
    )(x_pad, w_slab, p_slab)

    return out_pad[..., :DATA_DIM]


def generator_forward(x, w_slab, p_slab):
    """Single-batch forward matching Generator.forward: (B, 32) -> (B, 16)."""
    return generator_forward_batched(x[None], w_slab, p_slab)[0]


# --------------------------- deterministic params ----------------------------
def init_params(key):
    """Natural (PyTorch-shaped) parameters.

    Residual 1: Linear(32 -> 32)   Residual 2: Linear(64 -> 32)
    Final:      Linear(96 -> 16)
    """
    dims_in = [EMBEDDING_DIM,
               EMBEDDING_DIM + GENERATOR_DIM[0],
               EMBEDDING_DIM + GENERATOR_DIM[0] + GENERATOR_DIM[1]]
    dims_out = [GENERATOR_DIM[0], GENERATOR_DIM[1], DATA_DIM]

    keys = jax.random.split(key, 10)
    p = {}
    for idx, (din, dout) in enumerate(zip(dims_in, dims_out), start=1):
        scale = 1.0 / jnp.sqrt(jnp.float32(din))
        p[f"w{idx}"] = jax.random.uniform(
            keys[2 * (idx - 1)], (din, dout), jnp.float32, -scale, scale)
        p[f"b{idx}"] = jax.random.uniform(
            keys[2 * (idx - 1) + 1], (dout,), jnp.float32, -scale, scale)
    # BatchNorm affine params (randomized here to exercise the affine fold).
    p["g1"] = jax.random.uniform(keys[6], (GENERATOR_DIM[0],), jnp.float32, 0.5, 1.5)
    p["be1"] = jax.random.uniform(keys[7], (GENERATOR_DIM[0],), jnp.float32, -0.5, 0.5)
    p["g2"] = jax.random.uniform(keys[8], (GENERATOR_DIM[1],), jnp.float32, 0.5, 1.5)
    p["be2"] = jax.random.uniform(keys[9], (GENERATOR_DIM[1],), jnp.float32, -0.5, 0.5)
    return p


def pack_params(p):
    """Pack all parameters into two pre-padded, lane-dense VMEM slabs."""
    def pad_w(w):
        return jnp.zeros((PAD, PAD), jnp.float32).at[:w.shape[0], :w.shape[1]].set(w)

    g0, g1 = GENERATOR_DIM
    w2, w3 = p["w2"], p["w3"]
    w_slab = jnp.stack([
        pad_w(p["w1"]),           # x  -> residual-1 pre-activation
        pad_w(w2[:g0]),           # y1 -> residual-2 pre-activation
        pad_w(w2[g0:]),           # x  -> residual-2 pre-activation
        pad_w(w3[:g1]),           # y2 -> output
        pad_w(w3[g1:g1 + g0]),    # y1 -> output
        pad_w(w3[g1 + g0:]),      # x  -> output
    ])                            # (6, 128, 128)

    def pad_row(v):
        return jnp.zeros((PAD,), jnp.float32).at[:v.shape[0]].set(v)

    p_slab = jnp.stack([
        pad_row(p["b1"]), pad_row(p["g1"]), pad_row(p["be1"]),
        pad_row(p["b2"]), pad_row(p["g2"]), pad_row(p["be2"]),
        pad_row(p["b3"]), jnp.zeros((PAD,), jnp.float32),
    ])                            # (8, 128)
    return w_slab, p_slab


# ------------------------------ pure-JAX reference ---------------------------
def reference_forward(x, p):
    def residual(h, w, b, gamma, beta):
        y = h @ w + b
        mean = jnp.mean(y, axis=0, keepdims=True)
        var = jnp.mean((y - mean) ** 2, axis=0, keepdims=True)
        y = (y - mean) / jnp.sqrt(var + BN_EPS)
        y = y * gamma + beta
        return jnp.concatenate([jnp.maximum(y, 0.0), h], axis=1)

    h = residual(x, p["w1"], p["b1"], p["g1"], p["be1"])
    h = residual(h, p["w2"], p["b2"], p["g2"], p["be2"])
    return h @ p["w3"] + p["b3"]


# ----------------------------------- main ------------------------------------
if __name__ == "__main__":
    key = jax.random.PRNGKey(0)
    k_x, k_p = jax.random.split(key)

    params = init_params(k_p)
    w_slab, p_slab = pack_params(params)

    # Several independent BN batches handled in ONE kernel launch (gridded).
    NUM_BATCHES = 4
    xb = jax.random.normal(k_x, (NUM_BATCHES, BATCH, EMBEDDING_DIM), jnp.float32)

    out = jax.block_until_ready(generator_forward_batched(xb, w_slab, p_slab))
    assert out.shape == (NUM_BATCHES, BATCH, DATA_DIM), out.shape
    ref = jax.vmap(lambda xi: reference_forward(xi, params))(xb)
    assert jnp.allclose(out, ref, atol=1e-4, rtol=1e-4), \
        float(jnp.max(jnp.abs(out - ref)))

    # Single-batch path (matches the original module's forward signature).
    out1 = jax.block_until_ready(generator_forward(xb[0], w_slab, p_slab))
    ref1 = reference_forward(xb[0], params)
    assert out1.shape == (BATCH, DATA_DIM), out1.shape
    assert jnp.allclose(out1, ref1, atol=1e-4, rtol=1e-4), \
        float(jnp.max(jnp.abs(out1 - ref1)))

    print("KERNEL_OK")
</pallas_src>

<mosaic_0001>
module attributes {stable_mosaic.version = 11 : i64} {
  func.func @generator_kernel(%arg0: i32, %arg1: memref<1x8x128xf32, #tpu.memory_space<vmem>>, %arg2: memref<6x128x128xf32, #tpu.memory_space<vmem>>, %arg3: memref<8x128xf32, #tpu.memory_space<vmem>>, %arg4: memref<1x8x128xf32, #tpu.memory_space<vmem>>) attributes {dimension_semantics = [#tpu.dimension_semantics<parallel>], iteration_bounds = array<i64: 4>, scalar_prefetch = 0 : i64, scratch_operands = 0 : i64, tpu.core_type = #tpu.core_type<tc>, window_params = [{transform_indices = @transform_0, window_bounds = array<i64: 1, 8, 128>}, {pipeline_mode = #tpu.pipeline_mode<synchronous>, transform_indices = @transform_1, window_bounds = array<i64: 6, 128, 128>}, {pipeline_mode = #tpu.pipeline_mode<synchronous>, transform_indices = @transform_2, window_bounds = array<i64: 8, 128>}, {transform_indices = @transform_3, window_bounds = array<i64: 1, 8, 128>}]} {
    %c0 = arith.constant 0 : index
    %c0_0 = arith.constant 0 : index
    %c0_1 = arith.constant 0 : index
    %0 = vector.load %arg1[%c0, %c0_0, %c0_1] : memref<1x8x128xf32, #tpu.memory_space<vmem>>, vector<1x8x128xf32>
    %1 = vector.shape_cast %0 : vector<1x8x128xf32> to vector<8x128xf32>
    %c0_2 = arith.constant 0 : index
    %c0_3 = arith.constant 0 : index
    %c0_4 = arith.constant 0 : index
    %2 = vector.load %arg2[%c0_2, %c0_3, %c0_4] : memref<6x128x128xf32, #tpu.memory_space<vmem>>, vector<1x128x128xf32>
    %3 = vector.shape_cast %2 : vector<1x128x128xf32> to vector<128x128xf32>
    %c1 = arith.constant 1 : index
    %c0_5 = arith.constant 0 : index
    %c0_6 = arith.constant 0 : index
    %4 = vector.load %arg2[%c1, %c0_5, %c0_6] : memref<6x128x128xf32, #tpu.memory_space<vmem>>, vector<1x128x128xf32>
    %5 = vector.shape_cast %4 : vector<1x128x128xf32> to vector<128x128xf32>
    %c2 = arith.constant 2 : index
    %c0_7 = arith.constant 0 : index
    %c0_8 = arith.constant 0 : index
    %6 = vector.load %arg2[%c2, %c0_7, %c0_8] : memref<6x128x128xf32, #tpu.memory_space<vmem>>, vector<1x128x128xf32>
    %7 = vector.shape_cast %6 : vector<1x128x128xf32> to vector<128x128xf32>
    %c3 = arith.constant 3 : index
    %c0_9 = arith.constant 0 : index
    %c0_10 = arith.constant 0 : index
    %8 = vector.load %arg2[%c3, %c0_9, %c0_10] : memref<6x128x128xf32, #tpu.memory_space<vmem>>, vector<1x128x128xf32>
    %9 = vector.shape_cast %8 : vector<1x128x128xf32> to vector<128x128xf32>
    %c4 = arith.constant 4 : index
    %c0_11 = arith.constant 0 : index
    %c0_12 = arith.constant 0 : index
    %10 = vector.load %arg2[%c4, %c0_11, %c0_12] : memref<6x128x128xf32, #tpu.memory_space<vmem>>, vector<1x128x128xf32>
    %11 = vector.shape_cast %10 : vector<1x128x128xf32> to vector<128x128xf32>
    %c5 = arith.constant 5 : index
    %c0_13 = arith.constant 0 : index
    %c0_14 = arith.constant 0 : index
    %12 = vector.load %arg2[%c5, %c0_13, %c0_14] : memref<6x128x128xf32, #tpu.memory_space<vmem>>, vector<1x128x128xf32>
    %13 = vector.shape_cast %12 : vector<1x128x128xf32> to vector<128x128xf32>
    %c0_15 = arith.constant 0 : index
    %c0_16 = arith.constant 0 : index
    %14 = vector.load %arg3[%c0_15, %c0_16] : memref<8x128xf32, #tpu.memory_space<vmem>>, vector<1x128xf32>
    %c1_17 = arith.constant 1 : index
    %c0_18 = arith.constant 0 : index
    %15 = vector.load %arg3[%c1_17, %c0_18] : memref<8x128xf32, #tpu.memory_space<vmem>>, vector<1x128xf32>
    %c2_19 = arith.constant 2 : index
    %c0_20 = arith.constant 0 : index
    %16 = vector.load %arg3[%c2_19, %c0_20] : memref<8x128xf32, #tpu.memory_space<vmem>>, vector<1x128xf32>
    %c3_21 = arith.constant 3 : index
    %c0_22 = arith.constant 0 : index
    %17 = vector.load %arg3[%c3_21, %c0_22] : memref<8x128xf32, #tpu.memory_space<vmem>>, vector<1x128xf32>
    %c4_23 = arith.constant 4 : index
    %c0_24 = arith.constant 0 : index
    %18 = vector.load %arg3[%c4_23, %c0_24] : memref<8x128xf32, #tpu.memory_space<vmem>>, vector<1x128xf32>
    %c5_25 = arith.constant 5 : index
    %c0_26 = arith.constant 0 : index
    %19 = vector.load %arg3[%c5_25, %c0_26] : memref<8x128xf32, #tpu.memory_space<vmem>>, vector<1x128xf32>
    %c6 = arith.constant 6 : index
    %c0_27 = arith.constant 0 : index
    %20 = vector.load %arg3[%c6, %c0_27] : memref<8x128xf32, #tpu.memory_space<vmem>>, vector<1x128xf32>
    %cst = arith.constant dense<0.000000e+00> : vector<8x128xf32>
    %21 = tpu.matmul %1, %3, %cst {dimension_numbers = #tpu.dot_dimension_numbers<[1], [0], [0], [1], [0, 0, 1, 1], [], []>} : vector<8x128xf32>, vector<128x128xf32>, vector<8x128xf32> -> vector<8x128xf32>
    %22 = vector.broadcast %14 : vector<1x128xf32> to vector<8x128xf32>
    %23 = arith.addf %21, %22 : vector<8x128xf32>
    %cst_28 = arith.constant dense<0.000000e+00> : vector<128xf32>
    %24 = vector.multi_reduction <add>, %23, %cst_28 [0] : vector<8x128xf32> to vector<128xf32>
    %25 = vector.shape_cast %24 : vector<128xf32> to vector<1x128xf32>
    %cst_29 = arith.constant 8.000000e+00 : f32
    %26 = vector.broadcast %cst_29 : f32 to vector<1x128xf32>
    %27 = arith.divf %25, %26 : vector<1x128xf32>
    %28 = vector.broadcast %27 : vector<1x128xf32> to vector<8x128xf32>
    %29 = arith.subf %23, %28 : vector<8x128xf32>
    %30 = arith.mulf %29, %29 : vector<8x128xf32>
    %cst_30 = arith.constant dense<0.000000e+00> : vector<128xf32>
    %31 = vector.multi_reduction <add>, %30, %cst_30 [0] : vector<8x128xf32> to vector<128xf32>
    %32 = vector.shape_cast %31 : vector<128xf32> to vector<1x128xf32>
    %cst_31 = arith.constant 8.000000e+00 : f32
    %33 = vector.broadcast %cst_31 : f32 to vector<1x128xf32>
    %34 = arith.divf %32, %33 : vector<1x128xf32>
    %cst_32 = arith.constant 9.99999974E-6 : f32
    %35 = vector.broadcast %cst_32 : f32 to vector<1x128xf32>
    %36 = arith.addf %34, %35 : vector<1x128xf32>
    %37 = math.rsqrt %36 : vector<1x128xf32>
    %38 = arith.mulf %15, %37 : vector<1x128xf32>
    %39 = arith.mulf %27, %38 : vector<1x128xf32>
    %40 = arith.subf %16, %39 : vector<1x128xf32>
    %41 = vector.broadcast %38 : vector<1x128xf32> to vector<8x128xf32>
    %42 = arith.mulf %23, %41 : vector<8x128xf32>
    %43 = vector.broadcast %40 : vector<1x128xf32> to vector<8x128xf32>
    %44 = arith.addf %42, %43 : vector<8x128xf32>
    %cst_33 = arith.constant 0.000000e+00 : f32
    %45 = vector.broadcast %cst_33 : f32 to vector<8x128xf32>
    %46 = arith.maximumf %44, %45 : vector<8x128xf32>
    %cst_34 = arith.constant dense<0.000000e+00> : vector<8x128xf32>
    %47 = tpu.matmul %46, %5, %cst_34 {dimension_numbers = #tpu.dot_dimension_numbers<[1], [0], [0], [1], [0, 0, 1, 1], [], []>} : vector<8x128xf32>, vector<128x128xf32>, vector<8x128xf32> -> vector<8x128xf32>
    %cst_35 = arith.constant dense<0.000000e+00> : vector<8x128xf32>
    %48 = tpu.matmul %1, %7, %cst_35 {dimension_numbers = #tpu.dot_dimension_numbers<[1], [0], [0], [1], [0, 0, 1, 1], [], []>} : vector<8x128xf32>, vector<128x128xf32>, vector<8x128xf32> -> vector<8x128xf32>
    %49 = arith.addf %47, %48 : vector<8x128xf32>
    %50 = vector.broadcast %17 : vector<1x128xf32> to vector<8x128xf32>
    %51 = arith.addf %49, %50 : vector<8x128xf32>
    %cst_36 = arith.constant dense<0.000000e+00> : vector<128xf32>
    %52 = vector.multi_reduction <add>, %51, %cst_36 [0] : vector<8x128xf32> to vector<128xf32>
    %53 = vector.shape_cast %52 : vector<128xf32> to vector<1x128xf32>
    %cst_37 = arith.constant 8.000000e+00 : f32
    %54 = vector.broadcast %cst_37 : f32 to vector<1x128xf32>
    %55 = arith.divf %53, %54 : vector<1x128xf32>
    %56 = vector.broadcast %55 : vector<1x128xf32> to vector<8x128xf32>
    %57 = arith.subf %51, %56 : vector<8x128xf32>
    %58 = arith.mulf %57, %57 : vector<8x128xf32>
    %cst_38 = arith.constant dense<0.000000e+00> : vector<128xf32>
    %59 = vector.multi_reduction <add>, %58, %cst_38 [0] : vector<8x128xf32> to vector<128xf32>
    %60 = vector.shape_cast %59 : vector<128xf32> to vector<1x128xf32>
    %cst_39 = arith.constant 8.000000e+00 : f32
    %61 = vector.broadcast %cst_39 : f32 to vector<1x128xf32>
    %62 = arith.divf %60, %61 : vector<1x128xf32>
    %cst_40 = arith.constant 9.99999974E-6 : f32
    %63 = vector.broadcast %cst_40 : f32 to vector<1x128xf32>
    %64 = arith.addf %62, %63 : vector<1x128xf32>
    %65 = math.rsqrt %64 : vector<1x128xf32>
    %66 = arith.mulf %18, %65 : vector<1x128xf32>
    %67 = arith.mulf %55, %66 : vector<1x128xf32>
    %68 = arith.subf %19, %67 : vector<1x128xf32>
    %69 = vector.broadcast %66 : vector<1x128xf32> to vector<8x128xf32>
    %70 = arith.mulf %51, %69 : vector<8x128xf32>
    %71 = vector.broadcast %68 : vector<1x128xf32> to vector<8x128xf32>
    %72 = arith.addf %70, %71 : vector<8x128xf32>
    %cst_41 = arith.constant 0.000000e+00 : f32
    %73 = vector.broadcast %cst_41 : f32 to vector<8x128xf32>
    %74 = arith.maximumf %72, %73 : vector<8x128xf32>
    %cst_42 = arith.constant dense<0.000000e+00> : vector<8x128xf32>
    %75 = tpu.matmul %74, %9, %cst_42 {dimension_numbers = #tpu.dot_dimension_numbers<[1], [0], [0], [1], [0, 0, 1, 1], [], []>} : vector<8x128xf32>, vector<128x128xf32>, vector<8x128xf32> -> vector<8x128xf32>
    %cst_43 = arith.constant dense<0.000000e+00> : vector<8x128xf32>
    %76 = tpu.matmul %46, %11, %cst_43 {dimension_numbers = #tpu.dot_dimension_numbers<[1], [0], [0], [1], [0, 0, 1, 1], [], []>} : vector<8x128xf32>, vector<128x128xf32>, vector<8x128xf32> -> vector<8x128xf32>
    %77 = arith.addf %75, %76 : vector<8x128xf32>
    %cst_44 = arith.constant dense<0.000000e+00> : vector<8x128xf32>
    %78 = tpu.matmul %1, %13, %cst_44 {dimension_numbers = #tpu.dot_dimension_numbers<[1], [0], [0], [1], [0, 0, 1, 1], [], []>} : vector<8x128xf32>, vector<128x128xf32>, vector<8x128xf32> -> vector<8x128xf32>
    %79 = arith.addf %77, %78 : vector<8x128xf32>
    %80 = vector.broadcast %20 : vector<1x128xf32> to vector<8x128xf32>
    %81 = arith.addf %79, %80 : vector<8x128xf32>
    %c0_45 = arith.constant 0 : index
    %c0_46 = arith.constant 0 : index
    %c0_47 = arith.constant 0 : index
    %82 = vector.load %arg4[%c0_45, %c0_46, %c0_47] : memref<1x8x128xf32, #tpu.memory_space<vmem>>, vector<1x8x128xf32>
    %83 = vector.shape_cast %82 : vector<1x8x128xf32> to vector<8x128xf32>
    %84 = vector.shape_cast %81 : vector<8x128xf32> to vector<1x8x128xf32>
    tpu.vector_store %arg4[%c0_45, %c0_46, %c0_47], %84 {strides = array<i32>} : memref<1x8x128xf32, #tpu.memory_space<vmem>>, vector<1x8x128xf32>,
    return
  }
  func.func @transform_0(%arg0: i32) -> (i32, i32, i32) {
    %c0_i32 = arith.constant 0 : i32
    %c0_i32_0 = arith.constant 0 : i32
    %c0_i32_1 = arith.constant 0 : i32
    return %arg0, %c0_i32, %c0_i32_0 : i32, i32, i32
  }
  func.func @transform_1(%arg0: i32) -> (i32, i32, i32) {
    %c0_i32 = arith.constant 0 : i32
    %c0_i32_0 = arith.constant 0 : i32
    %c0_i32_1 = arith.constant 0 : i32
    %c0_i32_2 = arith.constant 0 : i32
    return %c0_i32, %c0_i32_0, %c0_i32_1 : i32, i32, i32
  }
  func.func @transform_2(%arg0: i32) -> (i32, i32) {
    %c0_i32 = arith.constant 0 : i32
    %c0_i32_0 = arith.constant 0 : i32
    %c0_i32_1 = arith.constant 0 : i32
    return %c0_i32, %c0_i32_0 : i32, i32
  }
  func.func @transform_3(%arg0: i32) -> (i32, i32, i32) {
    %c0_i32 = arith.constant 0 : i32
    %c0_i32_0 = arith.constant 0 : i32
    %c0_i32_1 = arith.constant 0 : i32
    return %arg0, %c0_i32, %c0_i32_0 : i32, i32, i32
  }
}

</mosaic_0001>

<bundles_post_ra>
// kernel: tpu_custom_call.1
= control target key start
LH: loop header
LB: loop body
LE: loop exit
PB: predicated region body
PF: predicated region fallthrough
CT: control target
= control target key end

     0   :  { %8 = vsyncpa [#allocation3], 0  ;;  %s1965_s0 = inlined_call_operand.hbm [shape: f32[4,8,128], index: 0, kind: input, shape index: {}]   ;;  %s1966_s1 = inlined_call_operand.hbm [shape: f32[6,128,128], index: 1, kind: input, shape index: {}]   ;;  %s1967_s2 = inlined_call_operand.hbm [shape: f32[8,128], index: 2, kind: input, shape index: {}]   ;;  %s1968_s3 = inlined_call_operand.hbm [shape: f32[4,8,128], index: 3, kind: output, shape index: {}]  }
   0x1   :  { %10 = vsyncpa [#allocation3 + $0x1], 0 }
   0x2   :  { %11 = vsyncpa [#allocation6], 0 }
   0x3   :  { %12 = vsyncpa [#allocation4], 0 }
   0x4   :  { %14 = vsyncpa [#allocation4 + $0x1], 0  ;;  %s1664_s12 = smov 0   ;;  %s1666_s13 = smov 0  }
   0x5   :  { %s1668_s14 = smov 0   ;;  %s1670_s15 = smov 0  }
   0x6 LB: > { %s1685_s16 = sadd.s32 4294967295, %s1633_s15   ;;  %s926_s17 = sadd.s32 4294967294, %s1633_s15   ;;  %s1633_s15 = sphi %s1670_s15, %s1987_s15   ;;  %s1629_s14 = sphi %s1668_s14, %s1986_s14   ;;  %s1625_s13 = sphi %s1666_s13, %s1985_s13   ;;  %s1621_s12 = sphi %s1664_s12, %s1984_s12  }
   0x7   : > { %p40_p0 = scmp.ne.s32.totalorder %s1625_s13, %s1621_s12  ;;  %p1969_p1 = scmp.eq.s32.totalorder %s1685_s16, 0 }
   0x8   : > { %p112_p3 = scmp.eq.s32.totalorder %s926_s17, 3  ;;  %p927_p5 = scmp.ge.s32.totalorder %s1633_s15, 1 }
   0x9   : > { %p1694_p4 = por %p1969_p1, %p40_p0  ;;  %p119_p7 = scmp.lt.s32.totalorder %s1633_s15, 5 }
   0xa   : > { %p1699_p6 = por %p112_p3, %p40_p0  ;;  %s1635_s21 = smov [#allocation5]  }
   0xb   : > { %s1972_s18 = scalar_select %p1694_p4, 1, 0 }
   0xc   : > { %s1973_s19 = scalar_select %p1699_p6, 1, 0 }
   0xd   : > { %p1704_p8 = pnand %p927_p5, %p119_p7  ;;  %s131_s22 = sshll.u32 %s1635_s21, 4  ;;  %s132_s22 = int_to_ptr.vmem [resolvable:$true] %s131_s22 }
   0xe   : > { %s1636_s24 = smov [#allocation7]   ;;  %s1477_s28 = scalar_lea.hbm %s1966_s1, 12288 }
   0xf   : > { %s1974_s20 = scalar_select %p1704_p8, 1, 0 }
  0x10   : > { %p1413_p9 = pneg %p1704_p8  ;;  %s145_s25 = sshll.u32 %s1636_s24, 4  ;;  %s1716_s25 = int_to_ptr.vmem [resolvable:$true] %s145_s25 }
  0x11   : > { %p1478_p11 = scmp.ne.s32.totalorder %s1966_s1, %s1477_s28  ;;  %p1484_p3 = scmp.lt.u32.totalorder %s1477_s28, %s1966_s1 }
  0x12   : > { %p1712_p10 = pnand %p1413_p9, %p1969_p1 }
  0x14   : > { %p1479_p12 = pneg %p1712_p10 }
  0x16   : > { %p1480_p13 = pnand %p1479_p12, %p1478_p11 }
  0x18   : > { %p1481_p0 = pneg %p1480_p13 }
  0x1a   : > { %p1486_p5 = pnand %p1484_p3, %p1481_p0 }
  0x1c   : > { %1489 = shalt.err (!%p1486_p5)
}
  0x1d   : > { %s1490_s6 = scalar_lea.vmem %s132_s22, 12288  ;;  %p1498_p2 = scmp.lt.s32.totalorder %s132_s22, %s132_s22 }
  0x1e   : > { %p1491_p7 = scmp.ne.s32.totalorder %s132_s22, %s1490_s6  ;;  %p1499_p6 = scmp.lt.s32.totalorder %s1490_s6, %s1490_s6 }
  0x20   : > { %p1493_p9 = pnand %p1491_p7, %p1479_p12  ;;  %p1500_p4 = por %p1499_p6, %p1498_p2 }
  0x22   : > { %p1494_p1 = pneg %p1493_p9 }
  0x24   : > { %p1501_p8 = pnand %p1500_p4, %p1494_p1 }
  0x26   : > { %1504 = shalt.err (!%p1501_p8)
}
  0x27   : > { %s1637_s7 = smov 128   ;;  %s1638_s8 = smov 8  }
  0x28   : > { %1416 = dma.hbm_to_vmem [thread:$0]  (!%p1712_p10), %s1966_s1, 12288, %s132_s22, [#allocation6], %s1637_s7, %s1637_s7, %s1638_s8  }
  0x29   : > { %s1505_s21 = scalar_lea.hbm %s1967_s2, 128 }
  0x2a   : > { %p1506_p11 = scmp.ne.s32.totalorder %s1967_s2, %s1505_s21  ;;  %p1512_p4 = scmp.lt.u32.totalorder %s1505_s21, %s1967_s2 }
  0x2c   : > { %p1508_p1 = pnand %p1506_p11, %p1479_p12 }
  0x2e   : > { %p1509_p2 = pneg %p1508_p1 }
  0x30   : > { %p1514_p6 = pnand %p1512_p4, %p1509_p2 }
  0x32   : > { %1517 = shalt.err (!%p1514_p6)
}
  0x33   : > { %s1518_s22 = scalar_lea.vmem %s1716_s25, 128  ;;  %p1526_p3 = scmp.lt.s32.totalorder %s1716_s25, %s1716_s25 }
  0x34   : > { %p1519_p8 = scmp.ne.s32.totalorder %s1716_s25, %s1518_s22  ;;  %p1527_p5 = scmp.lt.s32.totalorder %s1518_s22, %s1518_s22 }
  0x36   : > { %p1521_p13 = pnand %p1519_p8, %p1479_p12  ;;  %p1528_p7 = por %p1527_p5, %p1526_p3 }
  0x38   : > { %p1522_p0 = pneg %p1521_p13 }
  0x3a   : > { %p1529_p9 = pnand %p1528_p7, %p1522_p0 }
  0x3c   : > { %1532 = shalt.err (!%p1529_p9)
}
  0x3d   : > { %1419 = dma.hbm_to_vmem [thread:$0]  (!%p1712_p10), %s1967_s2, 128, %s1716_s25, [#allocation6]  }
  0x3e   : > { %s1766_s4 = sadd.s32 1, %s1633_s15   ;;  %s27_s23 = sadd.s32 1, %s1629_s14 }
  0x3f   : > { %s24_s5 = ssub.s32 %s1633_s15, %s1766_s4  ;;  %p34_p12 = scmp.ne.s32.totalorder %s1629_s14, %s1625_s13 }
  0x40   : > { %p25_p11 = scmp.eq.s32.totalorder %s24_s5, 0  ;;  %p35_p1 = scmp.eq.s32.totalorder %s1633_s15, 0 }
  0x41   : > { %p1976_p2 = scmp.eq.s32.totalorder %s1685_s16, 3  ;;  %p1430_p6 = scmp.lt.s32.totalorder %s1633_s15, 4 }
  0x42   : > { %s1782_s7 = scalar_select %p25_p11, %s1629_s14, %s27_s23  }
  0x43   : > { %p1776_p4 = por %p1976_p2, %p34_p12  ;;  %p36_p8 = por %p35_p1, %p34_p12 }
  0x44   : > { %s156_s8 = sand.u32 1, %s1629_s14   ;;  %s932_s25 = sshll.u32 %s1633_s15, 7 }
  0x45   : > { %s931_s9 = sshll.u32 %s156_s8, 3  ;;  %s1789_s17 = scalar_lea.hbm %s1965_s0, %s932_s25 }
  0x46   : > { %s160_s21 = scalar_lea.vmem [#allocation2], %s931_s9  ;;  %p1793_p10 = pnand %p1430_p6, %p36_p8 }
  0x47   : > { %s167_s24 = sshll.u32 %s160_s21, 4  ;;  %s157_s27 = scalar_lea.sflag [#allocation3], %s156_s8  ;;  %s1791_s24 = int_to_ptr.vmem [resolvable:$true] %s167_s24 }
  0x48   : > { %s1533_s28 = scalar_lea.hbm %s1789_s17, 128  ;;  %p1535_p0 = pneg %p1793_p10 }
  0x49   : > { %p1534_p13 = scmp.ne.s32.totalorder %s1789_s17, %s1533_s28  ;;  %s1538_s30 = scalar_lea.hbm %s1965_s0, 512 }
  0x4a   : > { %p1539_p7 = scmp.lt.u32.totalorder %s1789_s17, %s1965_s0  ;;  %p1540_p9 = scmp.lt.u32.totalorder %s1538_s30, %s1533_s28 }
  0x4b   : > { %p1536_p3 = pnand %p1535_p0, %p1534_p13  ;;  %p1542_p11 = scmp.lt.u32.totalorder %s1533_s28, %s1789_s17 }
  0x4c   : > { %p1541_p12 = por %p1540_p9, %p1539_p7 }
  0x4d   : > { %p1537_p5 = pneg %p1536_p3 }
  0x4e   : > { %p1543_p1 = por %p1542_p11, %p1541_p12 }
  0x50   : > { %p1544_p2 = pnand %p1543_p1, %p1537_p5 }
  0x52   : > { %1547 = shalt.err (!%p1544_p2)
}
  0x53   : > { %s1548_s8 = scalar_lea.vmem %s1791_s24, 128  ;;  %s1639_s9 = smov [#allocation2]  }
  0x54   : > { %p1549_p6 = scmp.ne.s32.totalorder %s1791_s24, %s1548_s8  ;;  %s1553_s25 = sshll.u32 %s1639_s9, 4  ;;  %s1554_s25 = int_to_ptr.vmem [resolvable:$false] %s1553_s25 }
  0x55   : > { %s1555_s10 = scalar_lea.vmem %s1554_s25, 256  ;;  %p1556_p3 = scmp.lt.s32.totalorder %s1791_s24, %s1554_s25 }
  0x56   : > { %p1551_p8 = pnand %p1549_p6, %p1535_p0  ;;  %p1557_p7 = scmp.lt.s32.totalorder %s1555_s10, %s1548_s8 }
  0x58   : > { %p1552_p13 = pneg %p1551_p8  ;;  %p1558_p9 = por %p1557_p7, %p1556_p3 }
  0x5a   : > { %p1559_p12 = pnand %p1558_p9, %p1552_p13 }
  0x5c   : > { %1562 = shalt.err (!%p1559_p12)
}
  0x5d   : > { %1423 = dma.hbm_to_vmem [thread:$0]  (!%p1793_p10), %s1789_s17, 128, %s1791_s24, %s157_s27  }
  0x5e   : > { %p1979_p5 = scmp.ne.s32.totalorder %s1974_s20, 0 }
  0x5f   : > { %s1825_s11 = sand.u32 (!%p1979_p5), 1, %s1625_s13   ;;  %p1980_p0 = scmp.ne.s32.totalorder (!%p1979_p5), %s1972_s18, 0 }
  0x60   : > { %176 = sbr.rel (%p1979_p5) target bundleno = 917 (0x395), region = 32  ;;  %s934_s21 = sshll.u32 (!%p1979_p5), %s1825_s11, 3 }
  0x61   : > { %s179_s28 = scalar_lea.sflag (!%p1979_p5), [#allocation3], %s1825_s11  ;;  %s1831_s22 = scalar_lea.vmem (!%p1979_p5), [#allocation2], %s934_s21 }
  0x67   : > { %1608 = dma.done.wait (%p1980_p0), %s179_s28, 128  }
  0x68   : > { %1610 = vsyncadd (%p1980_p0), %s179_s28, 4294967168  ;;  %p1981_p10 = scmp.eq.s32.totalorder %s1685_s16, 0 }
  0x6a   : > { %1612 = dma.done.wait (%p1981_p10), [#allocation6], 12416   ;;  %p1982_p11 = pmov %p1981_p10 }
  0x6b   : > { %v1640_v0 = vmov 0.0|0.0   ;;  %vm1641_vm0 = vmmov 0   ;;  %v1642_v1 = vmov 0.0   ;;  %v214_v2 = vld [vmem:[#allocation5] sm:$0xff]  ;;  %v215_v3 = vld [vmem:[#allocation5 + $0x8] sm:$0xff]  ;;  %v216_v4 = vld [vmem:[#allocation5 + $0x10] sm:$0xff] }
  0x6c   : > { %1614 = vsyncadd (%p1982_p11), [#allocation6], 4294954880  ;;  %1257 = vmatprep.subr.bf16.mxu0 %v1640_v0  ;;  %1079 = vmatprep.mubr.msk.f32.mxu0 %vm1641_vm0, %v1642_v1  ;;  %v1258_v5 = vpack.c.bf16 %v215_v3, %v214_v2  ;;  %v217_v6 = vld [vmem:[#allocation5 + $0x18] sm:$0xff]  ;;  %v218_v8 = vld [vmem:[#allocation5 + $0x20] sm:$0xff]  ;;  %s942_s18 = sshll.u32 %s1685_s16, 7  ;;  %s212_s20 = scalar_lea.vmem [#allocation8], %s934_s21 }
  0x6d   : > { %1281 = vmatprep.subr.bf16.mxu1 %v1640_v0  ;;  %1114 = vmatprep.mubr.msk.f32.mxu1 %vm1641_vm0, %v1642_v1  ;;  %v1261_v7 = vpack.c.bf16 %v217_v6, %v216_v4  ;;  %v219_v9 = vld [vmem:[#allocation5 + $0x28] sm:$0xff]  ;;  %v248_v10 = vld [vmem:[#allocation5 + $0x100] sm:$0xff]  ;;  %v220_v14 = vld [vmem:[#allocation5 + $0x30] sm:$0xff]  ;;  %s837_s17 = sshll.u32 %s212_s20, 4  ;;  %s1922_s27 = scalar_lea.hbm %s1968_s3, %s942_s18  ;;  %s1924_s17 = int_to_ptr.vmem [resolvable:$true] %s837_s17 }
  0x6e   : > { %1259 = vmatpush3.bf16.msra.mxu0 %v1258_v5  ;;  %v249_v11 = vld [vmem:[#allocation5 + $0x108] sm:$0xff]  ;;  %v1264_v12 = vpack.c.bf16 %v219_v9, %v218_v8  ;;  %v221_v15 = vld [vmem:[#allocation5 + $0x38] sm:$0xff]  ;;  %v222_v17 = vld [vmem:[#allocation5 + $0x40] sm:$0xff]  ;;  %s824_s29 = scalar_lea.sflag [#allocation4], %s1825_s11  ;;  %s1563_s30 = scalar_lea.vmem %s1924_s17, 128 }
  0x6f   : > { %1260 = vmatprep.subr.bf16.mxu0 %v1640_v0  ;;  %v1282_v13 = vpack.c.bf16 %v249_v11, %v248_v10  ;;  %v1267_v16 = vpack.c.bf16 %v221_v15, %v220_v14  ;;  %v223_v18 = vld [vmem:[#allocation5 + $0x48] sm:$0xff]  ;;  %v224_v20 = vld [vmem:[#allocation5 + $0x50] sm:$0xff]  ;;  %v225_v21 = vld [vmem:[#allocation5 + $0x58] sm:$0xff]  ;;  %p1564_p1 = scmp.ne.s32.totalorder %s1924_s17, %s1563_s30  ;;  %s1643_s16 = smov [#allocation8]  }
  0x70   : > { %v1270_v19 = vpack.c.bf16 %v223_v18, %v222_v17  ;;  %v1273_v22 = vpack.c.bf16 %v225_v21, %v224_v20  ;;  %v226_v23 = vld [vmem:[#allocation5 + $0x60] sm:$0xff]  ;;  %v227_v24 = vld [vmem:[#allocation5 + $0x68] sm:$0xff]  ;;  %v228_v26 = vld [vmem:[#allocation5 + $0x70] sm:$0xff]  ;;  %s1567_s23 = sshll.u32 %s1643_s16, 4  ;;  %s1568_s23 = int_to_ptr.vmem [resolvable:$false] %s1567_s23 }
  0x71   : > { %1283 = vmatpush3.bf16.msra.mxu1 %v1282_v13  ;;  %v1276_v25 = vpack.c.bf16 %v227_v24, %v226_v23  ;;  %v229_v27 = vld [vmem:[#allocation5 + $0x78] sm:$0xff]  ;;  %v250_v30 = vld [vmem:[#allocation5 + $0x110] sm:$0xff]  ;;  %v252_v33 = vld [vmem:[#allocation5 + $0x120] sm:$0xff]  ;;  %p1565_p2 = pnand %p1564_p1, %p1776_p4  ;;  %s1569_s5 = scalar_lea.vmem %s1568_s23, 256 }
  0x72   : > { %1262 = vmatpush3.bf16.msra.mxu0 %v1261_v7  ;;  %1284 = vmatprep.subr.bf16.mxu1 %v1640_v0  ;;  %v1279_v28 = vpack.c.bf16 %v229_v27, %v228_v26  ;;  %v1856_v29 = vld [vmem:[%s1831_s22] sm:$0xff]  ;;  %v253_v34 = vld [vmem:[#allocation5 + $0x128] sm:$0xff]  ;;  %v256_v39 = vld [vmem:[#allocation5 + $0x140] sm:$0xff]  ;;  %p1570_p8 = scmp.lt.s32.totalorder %s1924_s17, %s1568_s23  ;;  %p1571_p13 = scmp.lt.s32.totalorder %s1569_s5, %s1563_s30 }
  0x73   : > { %1263 = vmatprep.subr.bf16.mxu0 %v1640_v0  ;;  %v251_v31 = vld [vmem:[#allocation5 + $0x118] sm:$0xff]  ;;  %v1288_v35 = vpack.c.bf16 %v253_v34, %v252_v33  ;;  %v254_v36 = vld [vmem:[#allocation5 + $0x130] sm:$0xff]  ;;  %v257_v40 = vld [vmem:[#allocation5 + $0x148] sm:$0xff]  ;;  %p1566_p6 = pneg %p1565_p2 }
  0x74   : > { %v1285_v32 = vpack.c.bf16 %v251_v31, %v250_v30  ;;  %v255_v37 = vld [vmem:[#allocation5 + $0x138] sm:$0xff]  ;;  %v1294_v41 = vpack.c.bf16 %v257_v40, %v256_v39  ;;  %v258_v42 = vld [vmem:[#allocation5 + $0x150] sm:$0xff]  ;;  %v260_v45 = vld [vmem:[#allocation5 + $0x160] sm:$0xff]  ;;  %p1572_p3 = por %p1571_p13, %p1570_p8 }
  0x75   : > { %v1291_v38 = vpack.c.bf16 %v255_v37, %v254_v36  ;;  %v259_v43 = vld [vmem:[#allocation5 + $0x158] sm:$0xff]  ;;  %v261_v46 = vld [vmem:[#allocation5 + $0x168] sm:$0xff]  ;;  %v262_v48 = vld [vmem:[#allocation5 + $0x170] sm:$0xff] }
  0x76   : > { %1265 = vmatpush3.bf16.msra.mxu0 %v1264_v12  ;;  %1286 = vmatpush3.bf16.msra.mxu1 %v1285_v32  ;;  %v1297_v44 = vpack.c.bf16 %v259_v43, %v258_v42  ;;  %v1300_v47 = vpack.c.bf16 %v261_v46, %v260_v45  ;;  %v263_v49 = vld [vmem:[#allocation5 + $0x178] sm:$0xff]  ;;  %v231_v51 = vld [vmem:[#allocation5 + $0x80] sm:$0xff]  ;;  %v232_v52 = vld [vmem:[#allocation5 + $0x88] sm:$0xff]  ;;  %p1573_p7 = pnand %p1572_p3, %p1566_p6 }
  0x77   : > { %1266 = vmatprep.subr.bf16.mxu0 %v1640_v0  ;;  %1287 = vmatprep.subr.bf16.mxu1 %v1640_v0  ;;  %v1303_v50 = vpack.c.bf16 %v263_v49, %v262_v48  ;;  %v282_v53 = vld [vmem:[#allocation5 + $0x200] sm:$0xff]  ;;  %v1306_v54 = vpack.c.bf16 %v232_v52, %v231_v51  ;;  %v283_v55 = vld [vmem:[#allocation5 + $0x208] sm:$0xff]  ;;  %v233_v57 = vld [vmem:[#allocation5 + $0x90] sm:$0xff] }
  0x78   : > { %v1330_v56 = vpack.c.bf16 %v283_v55, %v282_v53  ;;  %v234_v58 = vld [vmem:[#allocation5 + $0x98] sm:$0xff]  ;;  %v284_v59 = vld [vmem:[#allocation5 + $0x210] sm:$0xff]  ;;  %v235_v63 = vld [vmem:[#allocation5 + $0xa0] sm:$0xff] }
  0x79   : > { %v1309_v60 = vpack.c.bf16 %v234_v58, %v233_v57  ;;  %v285_v61 = vld [vmem:[#allocation5 + $0x218] sm:$0xff]  ;;  %v236_v2 = vld [vmem:[#allocation5 + $0xa8] sm:$0xff]  ;;  %v286_v3 = vld [vmem:[#allocation5 + $0x220] sm:$0xff] }
  0x7a   : > { %1268 = vmatpush3.bf16.msra.mxu0 %v1267_v16  ;;  %1289 = vmatpush3.bf16.msra.mxu1 %v1288_v35  ;;  %v1333_v62 = vpack.c.bf16 %v285_v61, %v284_v59  ;;  %v1312_v4 = vpack.c.bf16 %v236_v2, %v235_v63  ;;  %v287_v5 = vld [vmem:[#allocation5 + $0x228] sm:$0xff]  ;;  %v237_v7 = vld [vmem:[#allocation5 + $0xb0] sm:$0xff]  ;;  %v238_v8 = vld [vmem:[#allocation5 + $0xb8] sm:$0xff]  ;;  %v418_v59 = vlaneseq }
  0x7b   : > { %1269 = vmatprep.subr.bf16.mxu0 %v1640_v0  ;;  %1290 = vmatprep.subr.bf16.mxu1 %v1640_v0  ;;  %v1336_v6 = vpack.c.bf16 %v287_v5, %v286_v3  ;;  %v288_v9 = vld [vmem:[#allocation5 + $0x230] sm:$0xff]  ;;  %v1315_v10 = vpack.c.bf16 %v238_v8, %v237_v7  ;;  %v289_v11 = vld [vmem:[#allocation5 + $0x238] sm:$0xff]  ;;  %v239_v13 = vld [vmem:[#allocation5 + $0xc0] sm:$0xff] }
  0x7c   : > { %v1339_v12 = vpack.c.bf16 %v289_v11, %v288_v9  ;;  %v240_v14 = vld [vmem:[#allocation5 + $0xc8] sm:$0xff]  ;;  %v290_v15 = vld [vmem:[#allocation5 + $0x240] sm:$0xff]  ;;  %v242_v20 = vld [vmem:[#allocation5 + $0xd8] sm:$0xff] }
  0x7d   : > { %v1318_v16 = vpack.c.bf16 %v240_v14, %v239_v13  ;;  %v291_v17 = vld [vmem:[#allocation5 + $0x248] sm:$0xff]  ;;  %v292_v21 = vld [vmem:[#allocation5 + $0x250] sm:$0xff]  ;;  %v293_v23 = vld [vmem:[#allocation5 + $0x258] sm:$0xff] }
  0x7e   : > { %1271 = vmatpush3.bf16.msra.mxu0 %v1270_v19  ;;  %1292 = vmatpush3.bf16.msra.mxu1 %v1291_v38  ;;  %v1342_v18 = vpack.c.bf16 %v291_v17, %v290_v15  ;;  %v241_v19 = vld [vmem:[#allocation5 + $0xd0] sm:$0xff]  ;;  %v1345_v24 = vpack.c.bf16 %v293_v23, %v292_v21  ;;  %v244_v26 = vld [vmem:[#allocation5 + $0xe8] sm:$0xff]  ;;  %v294_v27 = vld [vmem:[#allocation5 + $0x260] sm:$0xff] }
  0x7f   : > { %1272 = vmatprep.subr.bf16.mxu0 %v1640_v0  ;;  %1293 = vmatprep.subr.bf16.mxu1 %v1640_v0  ;;  %v295_v30 = vld [vmem:[#allocation5 + $0x268] sm:$0xff]  ;;  %v245_v32 = vld [vmem:[#allocation5 + $0xf0] sm:$0xff]  ;;  %v246_v33 = vld [vmem:[#allocation5 + $0xf8] sm:$0xff] }
  0x80   : > { %v1348_v31 = vpack.c.bf16 %v295_v30, %v294_v27  ;;  %v296_v34 = vld [vmem:[#allocation5 + $0x270] sm:$0xff]  ;;  %v1327_v35 = vpack.c.bf16 %v246_v33, %v245_v32  ;;  %v297_v36 = vld [vmem:[#allocation5 + $0x278] sm:$0xff]  ;;  %v938_v38 = vld [vmem:[#allocation7] ss:$0 sm:$0xff] }
  0x81   : > { %v1351_v37 = vpack.c.bf16 %v297_v36, %v296_v34  ;;  %v316_v61 = vld [vmem:[#allocation7 + $0x1] sm:$0x1]  ;;  %v317_v3 = vld [vmem:[#allocation7 + $0x2] sm:$0x1]  ;;  %v266_v14 = vld [vmem:[#allocation5 + $0x188] sm:$0xff] }
  0x82   : > { %1274 = vmatpush3.bf16.msra.mxu0 %v1273_v22  ;;  %1295 = vmatpush3.bf16.msra.mxu1 %v1294_v41  ;;  %v1321_v22 = vpack.c.bf16 %v242_v20, %v241_v19  ;;  %v265_v13 = vld [vmem:[#allocation5 + $0x180] sm:$0xff]  ;;  %v300_v17 = vld [vmem:[#allocation5 + $0x288] sm:$0xff]  ;;  %v267_v19 = vld [vmem:[#allocation5 + $0x190] sm:$0xff] }
  0x83   : > { %1275 = vmatprep.subr.bf16.mxu0 %v1640_v0  ;;  %1296 = vmatprep.subr.bf16.mxu1 %v1640_v0  ;;  %v1354_v15 = vpack.c.bf16 %v266_v14, %v265_v13  ;;  %v268_v20 = vld [vmem:[#allocation5 + $0x198] sm:$0xff]  ;;  %v303_v27 = vld [vmem:[#allocation5 + $0x2a0] sm:$0xff]  ;;  %v305_v33 = vld [vmem:[#allocation5 + $0x2b0] sm:$0xff] }
  0x84   : > { %v1357_v21 = vpack.c.bf16 %v268_v20, %v267_v19  ;;  %v272_v32 = vld [vmem:[#allocation5 + $0x1b8] sm:$0xff]  ;;  %v273_v36 = vld [vmem:[#allocation5 + $0x1c0] sm:$0xff] }
  0x86   : > { %1277 = vmatpush3.bf16.msra.mxu0 %v1276_v25  ;;  %1298 = vmatpush3.bf16.msra.mxu1 %v1297_v44  ;;  %v243_v25 = vld [vmem:[#allocation5 + $0xe0] sm:$0xff] }
  0x87   : > { %1278 = vmatprep.subr.bf16.mxu0 %v1640_v0  ;;  %1299 = vmatprep.subr.bf16.mxu1 %v1640_v0 }
  0x8a   : > { %1280 = vmatpush3.bf16.msra.mxu0 %v1279_v28  ;;  %1301 = vmatpush3.bf16.msra.mxu1 %v1300_v47  ;;  %v1324_v28 = vpack.c.bf16 %v244_v26, %v243_v25  ;;  %v270_v25 = vld [vmem:[#allocation5 + $0x1a8] sm:$0xff] }
  0x8b   : > { %1305 = vmatprep.subr.bf16.mxu0 %v1640_v0  ;;  %1302 = vmatprep.subr.bf16.mxu1 %v1640_v0 }
  0x8d   : > { %1080 = vmatmul.mubr.f32.vlgmr.msra.gmra.mrb[0].mxu0 %v1856_v29 }
  0x8e   : > { %1149 = vmatprep.mubr.msk.f32.mxu0 %vm1641_vm0, %v1642_v1  ;;  %1304 = vmatpush3.bf16.msra.mxu1 %v1303_v50 }
  0x8f   : > { %1329 = vmatprep.subr.bf16.mxu1 %v1640_v0  ;;  %1307 = vmatpush3.bf16.msra.mxu0 %v1306_v54 }
  0x90   : > { %1308 = vmatprep.subr.bf16.mxu0 %v1640_v0 }
  0x91   : > { %1115 = vmatmul.mubr.f32.vlgmr.msra.gmra.mrb[0].mxu1 %v1856_v29 }
  0x92   : > { %1184 = vmatprep.mubr.msk.f32.mxu1 %vm1641_vm0, %v1642_v1  ;;  %1331 = vmatpush3.bf16.msra.mxu1 %v1330_v56 }
  0x93   : > { %1332 = vmatprep.subr.bf16.mxu1 %v1640_v0  ;;  %1310 = vmatpush3.bf16.msra.mxu0 %v1309_v60  ;;  %v419_v60 = vshrl.u32 %v418_v59, 7 }
  0x94   : > { %1311 = vmatprep.subr.bf16.mxu0 %v1640_v0 }
  0x96   : > { %1334 = vmatpush3.bf16.msra.mxu1 %v1333_v62  ;;  %v1888_v62 = vsub.s32 0, %v419_v60 }
  0x97   : > { %1335 = vmatprep.subr.bf16.mxu1 %v1640_v0  ;;  %1313 = vmatpush3.bf16.msra.mxu0 %v1312_v4 }
  0x98   : > { %1314 = vmatprep.subr.bf16.mxu0 %v1640_v0 }
  0x9a   : > { %1337 = vmatpush3.bf16.msra.mxu1 %v1336_v6 }
  0x9b   : > { %1338 = vmatprep.subr.bf16.mxu1 %v1640_v0  ;;  %1316 = vmatpush3.bf16.msra.mxu0 %v1315_v10 }
  0x9c   : > { %1317 = vmatprep.subr.bf16.mxu0 %v1640_v0 }
  0x9e   : > { %1340 = vmatpush3.bf16.msra.mxu1 %v1339_v12 }
  0x9f   : > { %1341 = vmatprep.subr.bf16.mxu1 %v1640_v0  ;;  %1319 = vmatpush3.bf16.msra.mxu0 %v1318_v16  ;;  %v299_v16 = vld [vmem:[#allocation5 + $0x280] sm:$0xff] }
  0xa0   : > { %1320 = vmatprep.subr.bf16.mxu0 %v1640_v0 }
  0xa2   : > { %1343 = vmatpush3.bf16.msra.mxu1 %v1342_v18  ;;  %v1378_v18 = vpack.c.bf16 %v300_v17, %v299_v16 }
  0xa3   : > { %1344 = vmatprep.subr.bf16.mxu1 %v1640_v0  ;;  %1322 = vmatpush3.bf16.msra.mxu0 %v1321_v22  ;;  %v301_v22 = vld [vmem:[#allocation5 + $0x290] sm:$0xff] }
  0xa4   : > { %1323 = vmatprep.subr.bf16.mxu0 %v1640_v0 }
  0xa6   : > { %1346 = vmatpush3.bf16.msra.mxu1 %v1345_v24  ;;  %v269_v24 = vld [vmem:[#allocation5 + $0x1a0] sm:$0xff] }
  0xa7   : > { %1347 = vmatprep.subr.bf16.mxu1 %v1640_v0  ;;  %1325 = vmatpush3.bf16.msra.mxu0 %v1324_v28  ;;  %v1360_v26 = vpack.c.bf16 %v270_v25, %v269_v24  ;;  %v304_v28 = vld [vmem:[#allocation5 + $0x2a8] sm:$0xff]  ;;  %v320_v24 = vld [vmem:[#allocation7 + $0x5] sm:$0x1] }
  0xa8   : > { %1326 = vmatprep.subr.bf16.mxu0 %v1640_v0  ;;  %v1384_v30 = vpack.c.bf16 %v304_v28, %v303_v27 }
  0xaa   : > { %1349 = vmatpush3.bf16.msra.mxu1 %v1348_v31  ;;  %v271_v31 = vld [vmem:[#allocation5 + $0x1b0] sm:$0xff] }
  0xab   : > { %1350 = vmatprep.subr.bf16.mxu1 %v1640_v0  ;;  %1328 = vmatpush3.bf16.msra.mxu0 %v1327_v35  ;;  %v1363_v34 = vpack.c.bf16 %v272_v32, %v271_v31  ;;  %v306_v35 = vld [vmem:[#allocation5 + $0x2b8] sm:$0xff] }
  0xac   : > { %1353 = vmatprep.subr.bf16.mxu0 %v1640_v0 }
  0xae   : > { %1352 = vmatpush3.bf16.msra.mxu1 %v1351_v37  ;;  %v274_v37 = vld [vmem:[#allocation5 + $0x1c8] sm:$0xff] }
  0xaf   : > { %1377 = vmatprep.subr.bf16.mxu1 %v1640_v0 }
 0x160   : > { %v392_v39 = vpop.f32.mrb[0].mxu0 }
 0x161   : > { %v393_v40 = vadd.f32 %v938_v38, %v392_v39  ;;  %v1081_v41 = vpop.f32.mrb[1].mxu0  ;;  %v1387_v38 = vpack.c.bf16 %v306_v35, %v305_v33  ;;  %v307_v39 = vld [vmem:[#allocation5 + $0x2c0] sm:$0xff] }
 0x162   : > { %v1366_v41 = vpack.c.bf16 %v274_v37, %v273_v36 }
 0x163   : > { %v396_v42 = vrot.slane %v393_v40, 4 }
 0x164   : > { %v1896_v11 = vpop.f32.mrb[0].mxu1 }
 0x165   : > { %v397_v43 = vadd.f32 %v396_v42, %v393_v40  ;;  %v1116_v12 = vpop.f32.mrb[1].mxu1 }
 0x167   : > { %v398_v44 = vrot.slane %v397_v43, 2 }
 0x169   : > { %v399_v45 = vadd.f32 %v398_v44, %v397_v43  ;;  %v275_v43 = vld [vmem:[#allocation5 + $0x1d0] sm:$0xff]  ;;  %v276_v44 = vld [vmem:[#allocation5 + $0x1d8] sm:$0xff] }
 0x16b   : > { %v400_v46 = vrot.slane %v399_v45, 1 }
 0x16d   : > { %v401_v47 = vadd.f32 %v400_v46, %v399_v45  ;;  %v309_v45 = vld [vmem:[#allocation5 + $0x2d0] sm:$0xff]  ;;  %v310_v46 = vld [vmem:[#allocation5 + $0x2d8] sm:$0xff] }
 0x16f   : > { %v403_v48 = vmul.f32 0.125, %v401_v47  ;;  %v1369_v47 = vpack.c.bf16 %v276_v44, %v275_v43 }
 0x171   : > { %v404_v49 = vsub.f32 %v393_v40, %v403_v48 }
 0x173   : > { %v405_v50 = vmul.f32 %v404_v49, %v404_v49  ;;  %v277_v49 = vld [vmem:[#allocation5 + $0x1e0] sm:$0xff] }
 0x175   : > { %v406_v51 = vrot.slane %v405_v50, 4 }
 0x177   : > { %v407_v52 = vadd.f32 %v406_v51, %v405_v50  ;;  %v278_v50 = vld [vmem:[#allocation5 + $0x1e8] sm:$0xff]  ;;  %v311_v51 = vld [vmem:[#allocation5 + $0x2e0] sm:$0xff] }
 0x179   : > { %v408_v53 = vrot.slane %v407_v52, 2 }
 0x17b   : > { %v409_v54 = vadd.f32 %v408_v53, %v407_v52  ;;  %v312_v52 = vld [vmem:[#allocation5 + $0x2e8] sm:$0xff]  ;;  %v1372_v53 = vpack.c.bf16 %v278_v50, %v277_v49 }
 0x17d   : > { %v410_v55 = vrot.slane %v409_v54, 1 }
 0x17f   : > { %v411_v56 = vadd.f32 %v410_v55, %v409_v54  ;;  %v1396_v54 = vpack.c.bf16 %v312_v52, %v311_v51  ;;  %v279_v55 = vld [vmem:[#allocation5 + $0x1f0] sm:$0xff] }
 0x181   : > { %v412_v57 = vmul.f32 0.125, %v411_v56  ;;  %v280_v56 = vld [vmem:[#allocation5 + $0x1f8] sm:$0xff] }
 0x182   : > { %v1375_v59 = vpack.c.bf16 %v280_v56, %v279_v55 }
 0x183   : > { %v413_v58 = vadd.f32 1e-05, %v412_v57  ;;  %v313_v57 = vld [vmem:[#allocation5 + $0x2f0] sm:$0xff] }
 0x185   : > { %1473 = vrsqrt.f32 %v413_v58  ;;  %v314_v58 = vld [vmem:[#allocation5 + $0x2f8] sm:$0xff] }
 0x186   : > { %v1399_v60 = vpack.c.bf16 %v314_v58, %v313_v57 }
 0x18f   : > { %v1474_v63 = vpop.eup %1473 }
 0x190   : > { %v415_v2 = vmul.f32 %v1474_v63, %v316_v61  ;;  %v939_v61 = vld [vmem:[#allocation7 + $0x3] ss:$0 sm:$0xff] }
 0x192   : > { %v416_v4 = vmul.f32 %v415_v2, %v403_v48  ;;  %v421_v5 = vrot.slane %v415_v2, %v1888_v62  ;;  %v1393_v48 = vpack.c.bf16 %v310_v46, %v309_v45 }
 0x194   : > { %v417_v6 = vsub.f32 %v317_v3, %v416_v4  ;;  %v422_v7 = vmul.f32 %v421_v5, %v393_v40  ;;  %v308_v40 = vld [vmem:[#allocation5 + $0x2c8] sm:$0xff] }
 0x195   : > { %v1390_v42 = vpack.c.bf16 %v308_v40, %v307_v39 }
 0x196   : > { %v426_v8 = vrot.slane %v417_v6, %v1888_v62 }
 0x198   : > { %v427_v9 = vadd.f32 %v426_v8, %v422_v7 }
 0x19a   : > { %v428_v10 = vmax.f32 %v427_v9, 0.0 }
 0x19c   : > { %1150 = vmatmul.mubr.f32.vlgmr.msra.gmra.mrb[2].mxu0 %v428_v10  ;;  %1185 = vmatmul.mubr.f32.vlgmr.msra.gmra.mrb[2].mxu1 %v428_v10 }
 0x19d   : > { %1219 = vmatprep.mubr.msk.f32.mxu0 %vm1641_vm0, %v1642_v1  ;;  %1254 = vmatprep.mubr.msk.f32.mxu1 %vm1641_vm0, %v1642_v1  ;;  %v302_v1 = vld [vmem:[#allocation5 + $0x298] sm:$0xff] }
 0x19e   : > { %1355 = vmatpush3.bf16.msra.mxu0 %v1354_v15  ;;  %1379 = vmatpush3.bf16.msra.mxu1 %v1378_v18  ;;  %v1381_v23 = vpack.c.bf16 %v302_v1, %v301_v22  ;;  %v319_v22 = vld [vmem:[#allocation7 + $0x4] sm:$0x1] }
 0x19f   : > { %1356 = vmatprep.subr.bf16.mxu0 %v1640_v0  ;;  %1380 = vmatprep.subr.bf16.mxu1 %v1640_v0 }
 0x1a2   : > { %1358 = vmatpush3.bf16.msra.mxu0 %v1357_v21  ;;  %1382 = vmatpush3.bf16.msra.mxu1 %v1381_v23 }
 0x1a3   : > { %1359 = vmatprep.subr.bf16.mxu0 %v1640_v0  ;;  %1383 = vmatprep.subr.bf16.mxu1 %v1640_v0 }
 0x1a6   : > { %1361 = vmatpush3.bf16.msra.mxu0 %v1360_v26  ;;  %1385 = vmatpush3.bf16.msra.mxu1 %v1384_v30 }
 0x1a7   : > { %1362 = vmatprep.subr.bf16.mxu0 %v1640_v0  ;;  %1386 = vmatprep.subr.bf16.mxu1 %v1640_v0 }
 0x1aa   : > { %1364 = vmatpush3.bf16.msra.mxu0 %v1363_v34  ;;  %1388 = vmatpush3.bf16.msra.mxu1 %v1387_v38  ;;  %v940_v38 = vld [vmem:[#allocation7 + $0x6] ss:$0 sm:$0xff] }
 0x1ab   : > { %1365 = vmatprep.subr.bf16.mxu0 %v1640_v0  ;;  %1389 = vmatprep.subr.bf16.mxu1 %v1640_v0 }
 0x1ae   : > { %1367 = vmatpush3.bf16.msra.mxu0 %v1366_v41  ;;  %1391 = vmatpush3.bf16.msra.mxu1 %v1390_v42 }
 0x1af   : > { %1368 = vmatprep.subr.bf16.mxu0 %v1640_v0  ;;  %1392 = vmatprep.subr.bf16.mxu1 %v1640_v0 }
 0x1b2   : > { %1370 = vmatpush3.bf16.msra.mxu0 %v1369_v47  ;;  %1394 = vmatpush3.bf16.msra.mxu1 %v1393_v48 }
 0x1b3   : > { %1371 = vmatprep.subr.bf16.mxu0 %v1640_v0  ;;  %1395 = vmatprep.subr.bf16.mxu1 %v1640_v0 }
 0x1b6   : > { %1373 = vmatpush3.bf16.msra.mxu0 %v1372_v53  ;;  %1397 = vmatpush3.bf16.msra.mxu1 %v1396_v54 }
 0x1b7   : > { %1374 = vmatprep.subr.bf16.mxu0 %v1640_v0  ;;  %1398 = vmatprep.subr.bf16.mxu1 %v1640_v0 }
 0x1ba   : > { %1376 = vmatpush3.bf16.msra.mxu0 %v1375_v59  ;;  %1400 = vmatpush3.bf16.msra.mxu1 %v1399_v60 }
 0x1bd   : > { %1255 = vmatmul.mubr.f32.vlgmr.msra.gmra.mrb[4].mxu1 %v1856_v29 }
 0x26f   : > { %v565_v63 = vpop.f32.mrb[2].mxu0  ;;  %v672_v2 = vpop.f32.mrb[2].mxu1 }
 0x270   : > { %v566_v3 = vadd.f32 %v565_v63, %v1896_v11  ;;  %v1151_v4 = vpop.f32.mrb[3].mxu0  ;;  %v1186_v5 = vpop.f32.mrb[3].mxu1 }
 0x272   : > { %v573_v6 = vadd.f32 %v939_v61, %v566_v3 }
 0x274   : > { %v574_v7 = vrot.slane %v573_v6, 4 }
 0x276   : > { %v575_v8 = vadd.f32 %v574_v7, %v573_v6 }
 0x278   : > { %v576_v9 = vrot.slane %v575_v8, 2 }
 0x27a   : > { %v577_v10 = vadd.f32 %v576_v9, %v575_v8 }
 0x27c   : > { %v578_v12 = vrot.slane %v577_v10, 1 }
 0x27e   : > { %v579_v13 = vadd.f32 %v578_v12, %v577_v10 }
 0x280   : > { %v580_v14 = vmul.f32 0.125, %v579_v13 }
 0x282   : > { %v581_v0 = vsub.f32 %v573_v6, %v580_v14 }
 0x284   : > { %v582_v15 = vmul.f32 %v581_v0, %v581_v0 }
 0x286   : > { %v583_v16 = vrot.slane %v582_v15, 4 }
 0x288   : > { %v584_v17 = vadd.f32 %v583_v16, %v582_v15 }
 0x28a   : > { %v585_v29 = vrot.slane %v584_v17, 2 }
 0x28c   : > { %v586_v18 = vadd.f32 %v585_v29, %v584_v17 }
 0x28e   : > { %v587_v19 = vrot.slane %v586_v18, 1 }
 0x290   : > { %v588_v20 = vadd.f32 %v587_v19, %v586_v18  ;;  %v812_v33 = vpop.f32.mrb[4].mxu1 }
 0x291   : > { %v1256_v34 = vpop.f32.mrb[5].mxu1 }
 0x292   : > { %v589_v21 = vmul.f32 0.125, %v588_v20 }
 0x294   : > { %v590_v11 = vadd.f32 1e-05, %v589_v21 }
 0x296   : > { %1475 = vrsqrt.f32 %v590_v11 }
 0x2a0   : > { %v1476_v1 = vpop.eup %1475 }
 0x2a1   : > { %v592_v23 = vmul.f32 %v1476_v1, %v319_v22 }
 0x2a3   : > { %v593_v25 = vmul.f32 %v592_v23, %v580_v14  ;;  %v598_v26 = vrot.slane %v592_v23, %v1888_v62 }
 0x2a5   : > { %v594_v27 = vsub.f32 %v320_v24, %v593_v25  ;;  %v599_v28 = vmul.f32 %v598_v26, %v573_v6 }
 0x2a7   : > { %v603_v30 = vrot.slane %v594_v27, %v1888_v62 }
 0x2a9   : > { %v604_v31 = vadd.f32 %v603_v30, %v599_v28 }
 0x2ab   : > { %v605_v32 = vmax.f32 %v604_v31, 0.0 }
 0x2ad   : > { %1220 = vmatmul.mubr.f32.vlgmr.msra.gmra.mrb[4].mxu0 %v605_v32 }
 0x380   : > { %v742_v35 = vpop.f32.mrb[4].mxu0 }
 0x381   : > { %v743_v36 = vadd.f32 %v742_v35, %v672_v2  ;;  %v1221_v37 = vpop.f32.mrb[5].mxu0 }
 0x383   : > { %v816_v39 = vadd.f32 %v812_v33, %v743_v36 }
 0x385   : > { %v821_v40 = vadd.f32 %v940_v38, %v816_v39 }
 0x387   : > { %822 = vst [vmem:[%s212_s20] sm:$0xff] %v821_v40 }
 0x388   : > { %1576 = shalt.err (!%p1573_p7)
}
 0x389   : > { %s1577_s8 = scalar_lea.hbm %s1922_s27, 128  ;;  %s1581_s10 = scalar_lea.hbm %s1968_s3, 512 }
 0x38a   : > { %p1578_p9 = scmp.ne.s32.totalorder %s1922_s27, %s1577_s8  ;;  %p1582_p0 = scmp.lt.u32.totalorder %s1922_s27, %s1968_s3 }
 0x38b   : > { %p1583_p10 = scmp.lt.u32.totalorder %s1581_s10, %s1577_s8  ;;  %p1585_p1 = scmp.lt.u32.totalorder %s1577_s8, %s1922_s27 }
 0x38c   : > { %p1579_p12 = pnand %p1578_p9, %p1776_p4 }
 0x38d   : > { %p1584_p11 = por %p1583_p10, %p1582_p0 }
 0x38e   : > { %p1580_p5 = pneg %p1579_p12 }
 0x38f   : > { %p1586_p2 = por %p1585_p1, %p1584_p11 }
 0x391   : > { %p1587_p6 = pnand %p1586_p2, %p1580_p5 }
 0x393   : > { %1590 = shalt.err (!%p1587_p6)
}
 0x394   : > { %1411 = dma.vmem_to_hbm [thread:$0]  (%p1776_p4), %s1924_s17, 128, %s1922_s27, %s824_s29  }
 0x395 PF: > { %p1433_p8 = scmp.ge.s32.totalorder %s1633_s15, 2  ;;  %s849_s28 = sand.u32 1, %s1621_s12  }
 0x396   : > { %p1983_p13 = scmp.ne.s32.totalorder %s1973_s19, 0  ;;  %s850_s22 = scalar_lea.sflag [#allocation4], %s849_s28 }
 0x398   : > { %p1425_p3 = pnand %p1433_p8, %p1983_p13 }
 0x39a   : > { %1616 = dma.done.wait (!%p1425_p3), %s850_s22, 128  }
 0x39b   : > { %1618 = vsyncadd (!%p1425_p3), %s850_s22, 4294967168  ;;  %p17_p7 = scmp.ge.s32.totalorder %s1766_s4, 6   ;;  %s1984_s12 = smov %s1625_s13 }
 0x39c   : > { %s1985_s13 = smov %s1629_s14  ;;  %s1986_s14 = smov %s1782_s7 }
 0x39d   : > { %s1987_s15 = smov %s1766_s4  ;;  %19 = sbr.rel (!%p17_p7) target bundleno = 6 (0x6), region = 90 }
 0x3a4   :  { %855 = vsyncpa [#allocation3], 1 }
 0x3a5   :  { %857 = vsyncpa [#allocation3 + $0x1], 1 }
 0x3a6   :  { %858 = vsyncpa [#allocation6], 1 }
 0x3a7   :  { %859 = vsyncpa [#allocation4], 1 }
 0x3a8   :  { %861 = vsyncpa [#allocation4 + $0x1], 1 }

</bundles_post_ra>
